<compile_context>
chip_gen: v5e
topology: v5e:2x2
jax: 0.10.0
libtpu: 0.0.40
codegen_flags: <defaults>
</compile_context>

<pallas_src>
import math

import jax
import jax.numpy as jnp
from jax.experimental import pallas as pl
from jax.experimental.pallas import tpu as pltpu

EPS = 1e-7                       # torchvision default eps
LANE = 128                       # lanes per vreg row
TM_MAX = 1024                    # sublane rows per grid step (multiple of 8)

_PI_2 = math.pi / 2.0
_PI_4 = math.pi / 4.0
_TAN_3PI_8 = 2.414213562373095       # tan(3*pi/8)
_TAN_PI_8 = 0.41421356237309503      # tan(pi/8)
_FOUR_OVER_PI_SQ = 4.0 / (math.pi ** 2)


def _round_up(x, d):
    return ((x + d - 1) // d) * d


def _recip(x):
    """f32-accurate reciprocal: EUP approx `vrcp` + one Newton refinement."""
    r = pl.reciprocal(x, approx=True)
    return r * (2.0 - x * r)


def _atan(x):
    """float32-accurate arctangent (Cephes atanf) using VPU + EUP ops only.

    Range reduction uses a single fused numerator/denominator select so only
    one reciprocal is needed per call.
    """
    ax = jnp.abs(x)
    big = ax > _TAN_3PI_8
    mid = ax > _TAN_PI_8
    y0 = jnp.where(big, _PI_2, jnp.where(mid, _PI_4, 0.0))
    num = jnp.where(big, -1.0, jnp.where(mid, ax - 1.0, ax))
    den = jnp.where(big, ax, jnp.where(mid, ax + 1.0, 1.0))
    xr = num * _recip(den)
    z = xr * xr
    p = (((8.05374449538e-2 * z - 1.38776856032e-1) * z
          + 1.99777106478e-1) * z - 3.33329491539e-1)
    res = y0 + p * z * xr + xr          # res >= 0 (approximates atan(|x|))
    return jnp.where(x < 0.0, -res, res)


def ciou_kernel(boxes_ref, loss_ref):
    # boxes_ref: (8, TM, LANE) f32 block; loss_ref: (TM, LANE) f32 block.
    x1, y1, x2, y2 = boxes_ref[0], boxes_ref[1], boxes_ref[2], boxes_ref[3]
    x1g, y1g, x2g, y2g = boxes_ref[4], boxes_ref[5], boxes_ref[6], boxes_ref[7]

    # widths / heights (reused by union and aspect-ratio term)
    w_pred = x2 - x1
    h_pred = y2 - y1
    w_gt = x2g - x1g
    h_gt = y2g - y1g

    # --- intersection / union (max-clamp form; identical to masked select) ---
    iw = jnp.maximum(jnp.minimum(x2, x2g) - jnp.maximum(x1, x1g), 0.0)
    ih = jnp.maximum(jnp.minimum(y2, y2g) - jnp.maximum(y1, y1g), 0.0)
    intsct = iw * ih
    union = w_pred * h_pred + w_gt * h_gt - intsct
    iou = intsct * _recip(union + EPS)

    # --- DIoU term: enclosing-box diagonal vs center distance ---
    dw = jnp.maximum(x2, x2g) - jnp.minimum(x1, x1g)
    dh = jnp.maximum(y2, y2g) - jnp.minimum(y1, y1g)
    diag_sq = dw * dw + dh * dh + EPS
    dx = (x1 + x2) - (x1g + x2g)
    dy = (y1 + y2) - (y1g + y2g)
    centers_sq = 0.25 * (dx * dx + dy * dy)
    diou_loss = 1.0 - iou + centers_sq * _recip(diag_sq)

    # --- aspect-ratio consistency term (single atan via difference identity) ---
    num = w_gt * h_pred - w_pred * h_gt
    den = h_gt * h_pred + w_gt * w_pred
    dtheta = _atan(num * _recip(den))
    v = _FOUR_OVER_PI_SQ * (dtheta * dtheta)
    alpha = v * _recip(1.0 - iou + v + EPS)   # forward value of no_grad branch

    loss_ref[...] = diou_loss + alpha * v


def _ciou_pallas(boxes, m):
    """Run the kernel on component-major data. boxes: (8, m, 128) f32."""
    if m <= 8:
        tm = m                              # single block, full second-to-last dim
    else:
        # Aim for >= 2 grid steps (keeps both v7x TensorCores busy) while
        # capping the block at TM_MAX; tm must be a multiple of 8.
        tm = min(TM_MAX, _round_up((m + 1) // 2, 8))
    grid = (pl.cdiv(m, tm),)                # partial last block handled by Pallas

    n_pad = m * LANE
    return pl.pallas_call(
        ciou_kernel,
        out_shape=jax.ShapeDtypeStruct((m, LANE), jnp.float32),
        grid=grid,
        in_specs=[pl.BlockSpec((8, tm, LANE), lambda i: (0, i, 0))],
        out_specs=pl.BlockSpec((tm, LANE), lambda i: (i, 0)),
        compiler_params=pltpu.CompilerParams(
            dimension_semantics=("parallel",)),
        cost_estimate=pl.CostEstimate(
            flops=90 * n_pad, transcendentals=5 * n_pad,
            bytes_accessed=36 * n_pad),
    )(boxes)


def complete_iou_loss(output, target, reduction="none"):
    """CIoU loss. output/target: (N, 4) boxes in (x1, y1, x2, y2) format."""
    n = output.shape[0]
    assert output.shape == (n, 4) and target.shape == (n, 4)

    # Component-major repack: (8, N) -> pad lanes -> (8, m, 128).  This is one
    # transpose-fusion in XLA; callers holding component-major data can call
    # _ciou_pallas directly and skip it.
    comp = jnp.concatenate(
        [output.astype(jnp.float32).T, target.astype(jnp.float32).T], axis=0)
    m = pl.cdiv(n, LANE)
    n_pad = m * LANE
    if n_pad != n:
        # zero padding; padded lanes may compute NaN but are sliced off below
        comp = jnp.pad(comp, ((0, 0), (0, n_pad - n)))
    boxes = comp.reshape(8, m, LANE)

    loss = _ciou_pallas(boxes, m).reshape(n_pad)[:n]
    if reduction == "mean":
        return loss.mean()
    if reduction == "sum":
        return loss.sum()
    return loss  # 'none'


class CompleteIOULoss:
    """Mirror of the PyTorch module (forward only)."""

    def __init__(self, reduction="none"):
        self.reduction = reduction

    def __call__(self, output, target):
        return complete_iou_loss(output, target, self.reduction)


def _ciou_reference(output, target, eps=EPS):
    """Pure-JAX reference (torchvision math, XLA's arctan) for a sanity check."""
    o = output.astype(jnp.float32)
    t = target.astype(jnp.float32)
    x1, y1, x2, y2 = o[:, 0], o[:, 1], o[:, 2], o[:, 3]
    x1g, y1g, x2g, y2g = t[:, 0], t[:, 1], t[:, 2], t[:, 3]
    xkis1 = jnp.maximum(x1, x1g); ykis1 = jnp.maximum(y1, y1g)
    xkis2 = jnp.minimum(x2, x2g); ykis2 = jnp.minimum(y2, y2g)
    mask = (ykis2 > ykis1) & (xkis2 > xkis1)
    intsct = jnp.where(mask, (xkis2 - xkis1) * (ykis2 - ykis1), 0.0)
    union = (x2 - x1) * (y2 - y1) + (x2g - x1g) * (y2g - y1g) - intsct
    iou = intsct / (union + eps)
    xc1 = jnp.minimum(x1, x1g); yc1 = jnp.minimum(y1, y1g)
    xc2 = jnp.maximum(x2, x2g); yc2 = jnp.maximum(y2, y2g)
    diag = (xc2 - xc1) ** 2 + (yc2 - yc1) ** 2 + eps
    cdist = ((x2 + x1) / 2 - (x1g + x2g) / 2) ** 2 + \
            ((y2 + y1) / 2 - (y1g + y2g) / 2) ** 2
    diou = 1 - iou + cdist / diag
    v = (4 / (jnp.pi ** 2)) * (jnp.arctan((x2g - x1g) / (y2g - y1g))
                               - jnp.arctan((x2 - x1) / (y2 - y1))) ** 2
    alpha = v / (1 - iou + v + eps)
    return diou + alpha * v


if __name__ == "__main__":
    key = jax.random.PRNGKey(0)
    k1, k2, k3, k4 = jax.random.split(key, 4)
    N = 8  # number of box pairs

    # deterministic, valid boxes: x2 > x1, y2 > y1
    p_xy = jax.random.uniform(k1, (N, 2), jnp.float32, 0.0, 8.0)
    p_wh = jax.random.uniform(k2, (N, 2), jnp.float32, 1.0, 8.0)
    t_xy = jax.random.uniform(k3, (N, 2), jnp.float32, 0.0, 8.0)
    t_wh = jax.random.uniform(k4, (N, 2), jnp.float32, 1.0, 8.0)
    output = jnp.concatenate([p_xy, p_xy + p_wh], axis=-1)  # (N, 4)
    target = jnp.concatenate([t_xy, t_xy + t_wh], axis=-1)  # (N, 4)

    loss_fn = CompleteIOULoss(reduction="none")
    loss = loss_fn(output, target)
    jax.block_until_ready(loss)

    ref = _ciou_reference(output, target)
    assert loss.shape == (N,)
    assert jnp.allclose(loss, ref, rtol=1e-4, atol=1e-5), (loss, ref)

    # TODO(synk): alpha is computed under torch.no_grad() in torchvision; this
    # kernel matches the forward value only and defines no custom_vjp.
    print("KERNEL_OK")
</pallas_src>

<mosaic_0001>
module attributes {stable_mosaic.version = 11 : i64} {
  func.func @ciou_kernel(%arg0: i32, %arg1: memref<8x1x128xf32, #tpu.memory_space<vmem>>, %arg2: memref<1x128xf32, #tpu.memory_space<vmem>>) attributes {dimension_semantics = [#tpu.dimension_semantics<parallel>], iteration_bounds = array<i64: 1>, scalar_prefetch = 0 : i64, scratch_operands = 0 : i64, tpu.core_type = #tpu.core_type<tc>, window_params = [{transform_indices = @transform_0, window_bounds = array<i64: 8, 1, 128>}, {transform_indices = @transform_1, window_bounds = array<i64: 1, 128>}]} {
    %c0 = arith.constant 0 : index
    %c0_0 = arith.constant 0 : index
    %c0_1 = arith.constant 0 : index
    %0 = vector.load %arg1[%c0, %c0_0, %c0_1] : memref<8x1x128xf32, #tpu.memory_space<vmem>>, vector<1x1x128xf32>
    %1 = vector.shape_cast %0 : vector<1x1x128xf32> to vector<1x128xf32>
    %c1 = arith.constant 1 : index
    %c0_2 = arith.constant 0 : index
    %c0_3 = arith.constant 0 : index
    %2 = vector.load %arg1[%c1, %c0_2, %c0_3] : memref<8x1x128xf32, #tpu.memory_space<vmem>>, vector<1x1x128xf32>
    %3 = vector.shape_cast %2 : vector<1x1x128xf32> to vector<1x128xf32>
    %c2 = arith.constant 2 : index
    %c0_4 = arith.constant 0 : index
    %c0_5 = arith.constant 0 : index
    %4 = vector.load %arg1[%c2, %c0_4, %c0_5] : memref<8x1x128xf32, #tpu.memory_space<vmem>>, vector<1x1x128xf32>
    %5 = vector.shape_cast %4 : vector<1x1x128xf32> to vector<1x128xf32>
    %c3 = arith.constant 3 : index
    %c0_6 = arith.constant 0 : index
    %c0_7 = arith.constant 0 : index
    %6 = vector.load %arg1[%c3, %c0_6, %c0_7] : memref<8x1x128xf32, #tpu.memory_space<vmem>>, vector<1x1x128xf32>
    %7 = vector.shape_cast %6 : vector<1x1x128xf32> to vector<1x128xf32>
    %c4 = arith.constant 4 : index
    %c0_8 = arith.constant 0 : index
    %c0_9 = arith.constant 0 : index
    %8 = vector.load %arg1[%c4, %c0_8, %c0_9] : memref<8x1x128xf32, #tpu.memory_space<vmem>>, vector<1x1x128xf32>
    %9 = vector.shape_cast %8 : vector<1x1x128xf32> to vector<1x128xf32>
    %c5 = arith.constant 5 : index
    %c0_10 = arith.constant 0 : index
    %c0_11 = arith.constant 0 : index
    %10 = vector.load %arg1[%c5, %c0_10, %c0_11] : memref<8x1x128xf32, #tpu.memory_space<vmem>>, vector<1x1x128xf32>
    %11 = vector.shape_cast %10 : vector<1x1x128xf32> to vector<1x128xf32>
    %c6 = arith.constant 6 : index
    %c0_12 = arith.constant 0 : index
    %c0_13 = arith.constant 0 : index
    %12 = vector.load %arg1[%c6, %c0_12, %c0_13] : memref<8x1x128xf32, #tpu.memory_space<vmem>>, vector<1x1x128xf32>
    %13 = vector.shape_cast %12 : vector<1x1x128xf32> to vector<1x128xf32>
    %c7 = arith.constant 7 : index
    %c0_14 = arith.constant 0 : index
    %c0_15 = arith.constant 0 : index
    %14 = vector.load %arg1[%c7, %c0_14, %c0_15] : memref<8x1x128xf32, #tpu.memory_space<vmem>>, vector<1x1x128xf32>
    %15 = vector.shape_cast %14 : vector<1x1x128xf32> to vector<1x128xf32>
    %16 = arith.subf %5, %1 : vector<1x128xf32>
    %17 = arith.subf %7, %3 : vector<1x128xf32>
    %18 = arith.subf %13, %9 : vector<1x128xf32>
    %19 = arith.subf %15, %11 : vector<1x128xf32>
    %20 = arith.minimumf %5, %13 : vector<1x128xf32>
    %21 = arith.maximumf %1, %9 : vector<1x128xf32>
    %22 = arith.subf %20, %21 : vector<1x128xf32>
    %cst = arith.constant 0.000000e+00 : f32
    %23 = vector.broadcast %cst : f32 to vector<1x128xf32>
    %24 = arith.maximumf %22, %23 : vector<1x128xf32>
    %25 = arith.minimumf %7, %15 : vector<1x128xf32>
    %26 = arith.maximumf %3, %11 : vector<1x128xf32>
    %27 = arith.subf %25, %26 : vector<1x128xf32>
    %cst_16 = arith.constant 0.000000e+00 : f32
    %28 = vector.broadcast %cst_16 : f32 to vector<1x128xf32>
    %29 = arith.maximumf %27, %28 : vector<1x128xf32>
    %30 = arith.mulf %24, %29 : vector<1x128xf32>
    %31 = arith.mulf %16, %17 : vector<1x128xf32>
    %32 = arith.mulf %18, %19 : vector<1x128xf32>
    %33 = arith.addf %31, %32 : vector<1x128xf32>
    %34 = arith.subf %33, %30 : vector<1x128xf32>
    %cst_17 = arith.constant 1.000000e-07 : f32
    %35 = vector.broadcast %cst_17 : f32 to vector<1x128xf32>
    %36 = arith.addf %34, %35 : vector<1x128xf32>
    %37 = tpu.reciprocal %36 {approx = true} : vector<1x128xf32> -> vector<1x128xf32>
    %38 = arith.mulf %36, %37 : vector<1x128xf32>
    %cst_18 = arith.constant 2.000000e+00 : f32
    %39 = vector.broadcast %cst_18 : f32 to vector<1x128xf32>
    %40 = arith.subf %39, %38 : vector<1x128xf32>
    %41 = arith.mulf %37, %40 : vector<1x128xf32>
    %42 = arith.mulf %30, %41 : vector<1x128xf32>
    %43 = arith.maximumf %5, %13 : vector<1x128xf32>
    %44 = arith.minimumf %1, %9 : vector<1x128xf32>
    %45 = arith.subf %43, %44 : vector<1x128xf32>
    %46 = arith.maximumf %7, %15 : vector<1x128xf32>
    %47 = arith.minimumf %3, %11 : vector<1x128xf32>
    %48 = arith.subf %46, %47 : vector<1x128xf32>
    %49 = arith.mulf %45, %45 : vector<1x128xf32>
    %50 = arith.mulf %48, %48 : vector<1x128xf32>
    %51 = arith.addf %49, %50 : vector<1x128xf32>
    %cst_19 = arith.constant 1.000000e-07 : f32
    %52 = vector.broadcast %cst_19 : f32 to vector<1x128xf32>
    %53 = arith.addf %51, %52 : vector<1x128xf32>
    %54 = arith.addf %1, %5 : vector<1x128xf32>
    %55 = arith.addf %9, %13 : vector<1x128xf32>
    %56 = arith.subf %54, %55 : vector<1x128xf32>
    %57 = arith.addf %3, %7 : vector<1x128xf32>
    %58 = arith.addf %11, %15 : vector<1x128xf32>
    %59 = arith.subf %57, %58 : vector<1x128xf32>
    %60 = arith.mulf %56, %56 : vector<1x128xf32>
    %61 = arith.mulf %59, %59 : vector<1x128xf32>
    %62 = arith.addf %60, %61 : vector<1x128xf32>
    %cst_20 = arith.constant 2.500000e-01 : f32
    %63 = vector.broadcast %cst_20 : f32 to vector<1x128xf32>
    %64 = arith.mulf %63, %62 : vector<1x128xf32>
    %cst_21 = arith.constant 1.000000e+00 : f32
    %65 = vector.broadcast %cst_21 : f32 to vector<1x128xf32>
    %66 = arith.subf %65, %42 : vector<1x128xf32>
    %67 = tpu.reciprocal %53 {approx = true} : vector<1x128xf32> -> vector<1x128xf32>
    %68 = arith.mulf %53, %67 : vector<1x128xf32>
    %cst_22 = arith.constant 2.000000e+00 : f32
    %69 = vector.broadcast %cst_22 : f32 to vector<1x128xf32>
    %70 = arith.subf %69, %68 : vector<1x128xf32>
    %71 = arith.mulf %67, %70 : vector<1x128xf32>
    %72 = arith.mulf %64, %71 : vector<1x128xf32>
    %73 = arith.addf %66, %72 : vector<1x128xf32>
    %74 = arith.mulf %18, %17 : vector<1x128xf32>
    %75 = arith.mulf %16, %19 : vector<1x128xf32>
    %76 = arith.subf %74, %75 : vector<1x128xf32>
    %77 = arith.mulf %19, %17 : vector<1x128xf32>
    %78 = arith.mulf %18, %16 : vector<1x128xf32>
    %79 = arith.addf %77, %78 : vector<1x128xf32>
    %80 = tpu.reciprocal %79 {approx = true} : vector<1x128xf32> -> vector<1x128xf32>
    %81 = arith.mulf %79, %80 : vector<1x128xf32>
    %cst_23 = arith.constant 2.000000e+00 : f32
    %82 = vector.broadcast %cst_23 : f32 to vector<1x128xf32>
    %83 = arith.subf %82, %81 : vector<1x128xf32>
    %84 = arith.mulf %80, %83 : vector<1x128xf32>
    %85 = arith.mulf %76, %84 : vector<1x128xf32>
    %86 = math.absf %85 : vector<1x128xf32>
    %cst_24 = arith.constant 2.41421366 : f32
    %87 = vector.broadcast %cst_24 : f32 to vector<1x128xf32>
    %88 = arith.cmpf ogt, %86, %87 : vector<1x128xf32>
    %cst_25 = arith.constant 0.414213568 : f32
    %89 = vector.broadcast %cst_25 : f32 to vector<1x128xf32>
    %90 = arith.cmpf ogt, %86, %89 : vector<1x128xf32>
    %cst_26 = arith.constant 0.785398185 : f32
    %cst_27 = arith.constant 0.000000e+00 : f32
    %91 = vector.broadcast %cst_26 : f32 to vector<1x128xf32>
    %92 = vector.broadcast %cst_27 : f32 to vector<1x128xf32>
    %93 = arith.select %90, %91, %92 : vector<1x128xi1>, vector<1x128xf32>
    %cst_28 = arith.constant 1.57079637 : f32
    %94 = vector.broadcast %cst_28 : f32 to vector<1x128xf32>
    %95 = arith.select %88, %94, %93 : vector<1x128xi1>, vector<1x128xf32>
    %cst_29 = arith.constant 1.000000e+00 : f32
    %96 = vector.broadcast %cst_29 : f32 to vector<1x128xf32>
    %97 = arith.subf %86, %96 : vector<1x128xf32>
    %98 = arith.select %90, %97, %86 : vector<1x128xi1>, vector<1x128xf32>
    %cst_30 = arith.constant -1.000000e+00 : f32
    %99 = vector.broadcast %cst_30 : f32 to vector<1x128xf32>
    %100 = arith.select %88, %99, %98 : vector<1x128xi1>, vector<1x128xf32>
    %cst_31 = arith.constant 1.000000e+00 : f32
    %101 = vector.broadcast %cst_31 : f32 to vector<1x128xf32>
    %102 = arith.addf %86, %101 : vector<1x128xf32>
    %cst_32 = arith.constant 1.000000e+00 : f32
    %103 = vector.broadcast %cst_32 : f32 to vector<1x128xf32>
    %104 = arith.select %90, %102, %103 : vector<1x128xi1>, vector<1x128xf32>
    %105 = arith.select %88, %86, %104 : vector<1x128xi1>, vector<1x128xf32>
    %106 = tpu.reciprocal %105 {approx = true} : vector<1x128xf32> -> vector<1x128xf32>
    %107 = arith.mulf %105, %106 : vector<1x128xf32>
    %cst_33 = arith.constant 2.000000e+00 : f32
    %108 = vector.broadcast %cst_33 : f32 to vector<1x128xf32>
    %109 = arith.subf %108, %107 : vector<1x128xf32>
    %110 = arith.mulf %106, %109 : vector<1x128xf32>
    %111 = arith.mulf %100, %110 : vector<1x128xf32>
    %112 = arith.mulf %111, %111 : vector<1x128xf32>
    %cst_34 = arith.constant 0.0805374458 : f32
    %113 = vector.broadcast %cst_34 : f32 to vector<1x128xf32>
    %114 = arith.mulf %113, %112 : vector<1x128xf32>
    %cst_35 = arith.constant 0.138776854 : f32
    %115 = vector.broadcast %cst_35 : f32 to vector<1x128xf32>
    %116 = arith.subf %114, %115 : vector<1x128xf32>
    %117 = arith.mulf %116, %112 : vector<1x128xf32>
    %cst_36 = arith.constant 0.199777111 : f32
    %118 = vector.broadcast %cst_36 : f32 to vector<1x128xf32>
    %119 = arith.addf %117, %118 : vector<1x128xf32>
    %120 = arith.mulf %119, %112 : vector<1x128xf32>
    %cst_37 = arith.constant 0.333329499 : f32
    %121 = vector.broadcast %cst_37 : f32 to vector<1x128xf32>
    %122 = arith.subf %120, %121 : vector<1x128xf32>
    %123 = arith.mulf %122, %112 : vector<1x128xf32>
    %124 = arith.mulf %123, %111 : vector<1x128xf32>
    %125 = arith.addf %95, %124 : vector<1x128xf32>
    %126 = arith.addf %125, %111 : vector<1x128xf32>
    %cst_38 = arith.constant 0.000000e+00 : f32
    %127 = vector.broadcast %cst_38 : f32 to vector<1x128xf32>
    %128 = arith.cmpf olt, %85, %127 : vector<1x128xf32>
    %cst_39 = arith.constant 0.000000e+00 : f32
    %129 = vector.broadcast %cst_39 : f32 to vector<1x128xf32>
    %130 = arith.subf %129, %126 : vector<1x128xf32>
    %131 = arith.select %128, %130, %126 : vector<1x128xi1>, vector<1x128xf32>
    %132 = arith.mulf %131, %131 : vector<1x128xf32>
    %cst_40 = arith.constant 0.405284733 : f32
    %133 = vector.broadcast %cst_40 : f32 to vector<1x128xf32>
    %134 = arith.mulf %133, %132 : vector<1x128xf32>
    %cst_41 = arith.constant 1.000000e+00 : f32
    %135 = vector.broadcast %cst_41 : f32 to vector<1x128xf32>
    %136 = arith.subf %135, %42 : vector<1x128xf32>
    %137 = arith.addf %136, %134 : vector<1x128xf32>
    %cst_42 = arith.constant 1.000000e-07 : f32
    %138 = vector.broadcast %cst_42 : f32 to vector<1x128xf32>
    %139 = arith.addf %137, %138 : vector<1x128xf32>
    %140 = tpu.reciprocal %139 {approx = true} : vector<1x128xf32> -> vector<1x128xf32>
    %141 = arith.mulf %139, %140 : vector<1x128xf32>
    %cst_43 = arith.constant 2.000000e+00 : f32
    %142 = vector.broadcast %cst_43 : f32 to vector<1x128xf32>
    %143 = arith.subf %142, %141 : vector<1x128xf32>
    %144 = arith.mulf %140, %143 : vector<1x128xf32>
    %145 = arith.mulf %134, %144 : vector<1x128xf32>
    %146 = arith.mulf %145, %134 : vector<1x128xf32>
    %147 = arith.addf %73, %146 : vector<1x128xf32>
    %c0_44 = arith.constant 0 : index
    %c0_45 = arith.constant 0 : index
    %148 = vector.load %arg2[%c0_44, %c0_45] : memref<1x128xf32, #tpu.memory_space<vmem>>, vector<1x128xf32>
    tpu.vector_store %arg2[%c0_44, %c0_45], %147 {strides = array<i32>} : memref<1x128xf32, #tpu.memory_space<vmem>>, vector<1x128xf32>,
    return
  }
  func.func @transform_0(%arg0: i32) -> (i32, i32, i32) {
    %c0_i32 = arith.constant 0 : i32
    %c0_i32_0 = arith.constant 0 : i32
    %c0_i32_1 = arith.constant 0 : i32
    return %c0_i32, %arg0, %c0_i32_0 : i32, i32, i32
  }
  func.func @transform_1(%arg0: i32) -> (i32, i32) {
    %c0_i32 = arith.constant 0 : i32
    %c0_i32_0 = arith.constant 0 : i32
    return %arg0, %c0_i32 : i32, i32
  }
}

</mosaic_0001>

<bundles_post_ra>
// kernel: tpu_custom_call.1
= control target key start
LH: loop header
LB: loop body
LE: loop exit
PB: predicated region body
PF: predicated region fallthrough
CT: control target
= control target key end

     0   :  { %6 = vsyncpa [#allocation3], 0  ;;  %s260_s0 = inlined_call_operand.hbm [shape: f32[8,1,128], index: 0, kind: input, shape index: {}]   ;;  %s261_s1 = inlined_call_operand.hbm [shape: f32[1,128], index: 1, kind: output, shape index: {}]  }
   0x1   :  { %7 = vsyncpa [#allocation4], 0  ;;  %s12_s8 = sshll.u32 %s260_s0, 4  ;;  %s230_s9 = smov [#allocation2]   ;;  %s13_s8 = int_to_ptr.hbm [resolvable:$true] %s12_s8 }
   0x2   :  { %s14_s10 = sshll.u32 %s230_s9, 4  ;;  %s231_s11 = smov 16   ;;  %s15_s10 = int_to_ptr.vmem [resolvable:$true] %s14_s10 }
   0x3   :  { %s232_s12 = smov 1  }
   0x4   :  { %20 = dma.hbm_to_vmem [thread:$0]  %s13_s8, 128, %s15_s10, [#allocation3], %s231_s11, %s231_s11, %s232_s12  }
   0x5   :  { %226 = dma.done.wait [#allocation3], 128  }
   0x6   :  { %227 = vsyncadd [#allocation3], 4294967168  ;;  %v25_v0 = vld [vmem:[#allocation2] sm:$0x1]  ;;  %v29_v1 = vld [vmem:[#allocation2 + $0x2] sm:$0x1] }
   0x7   :  { %v27_v2 = vld [vmem:[#allocation2 + $0x1] sm:$0x1]  ;;  %v31_v3 = vld [vmem:[#allocation2 + $0x3] sm:$0x1]  ;;  %v33_v4 = vld [vmem:[#allocation2 + $0x4] sm:$0x1]  ;;  %v73_v5 = vadd.f32 %v29_v1, %v25_v0  ;;  %v40_v10 = vsub.f32 %v29_v1, %v25_v0 }
   0x8   :  { %v35_v6 = vld [vmem:[#allocation2 + $0x5] sm:$0x1]  ;;  %v37_v7 = vld [vmem:[#allocation2 + $0x6] sm:$0x1]  ;;  %v39_v8 = vld [vmem:[#allocation2 + $0x7] sm:$0x1]  ;;  %v64_v9 = vmin.f32 %v25_v0, %v33_v4  ;;  %v41_v14 = vsub.f32 %v31_v3, %v27_v2  ;;  %v76_v20 = vadd.f32 %v31_v3, %v27_v2  ;;  %v45_v48 = vmax.f32 %v25_v0, %v33_v4 }
   0x9   :  { %v63_v11 = vmax.f32 %v29_v1, %v37_v7  ;;  %v66_v12 = vmax.f32 %v31_v3, %v39_v8  ;;  %v67_v13 = vmin.f32 %v27_v2, %v35_v6  ;;  %v42_v15 = vsub.f32 %v37_v7, %v33_v4  ;;  %s234_s0 = smov [#allocation5]   ;;  %s150_s16 = sshll.u32 %s261_s1, 4  ;;  %s151_s16 = int_to_ptr.hbm [resolvable:$true] %s150_s16 }
   0xa   :  { %v43_v16 = vsub.f32 %v39_v8, %v35_v6  ;;  %v74_v17 = vadd.f32 %v37_v7, %v33_v4  ;;  %v77_v21 = vadd.f32 %v39_v8, %v35_v6  ;;  %v44_v47 = vmin.f32 %v29_v1, %v37_v7  ;;  %s148_s13 = sshll.u32 %s234_s0, 4  ;;  %s149_s13 = int_to_ptr.vmem [resolvable:$true] %s148_s13 }
   0xb   :  { %v65_v18 = vsub.f32 %v63_v11, %v64_v9  ;;  %v68_v19 = vsub.f32 %v66_v12, %v67_v13  ;;  %v94_v30 = vmul.f32 %v42_v15, %v40_v10  ;;  %v90_v36 = vmul.f32 %v42_v15, %v41_v14 }
   0xc   :  { %v75_v22 = vsub.f32 %v73_v5, %v74_v17  ;;  %v78_v25 = vsub.f32 %v76_v20, %v77_v21  ;;  %v93_v27 = vmul.f32 %v43_v16, %v41_v14  ;;  %v91_v37 = vmul.f32 %v43_v16, %v40_v10 }
   0xd   :  { %v69_v23 = vmul.f32 %v65_v18, %v65_v18  ;;  %v70_v24 = vmul.f32 %v68_v19, %v68_v19  ;;  %v48_v49 = vmin.f32 %v31_v3, %v39_v8  ;;  %v49_v50 = vmax.f32 %v27_v2, %v35_v6 }
   0xe   :  { %v79_v26 = vmul.f32 %v75_v22, %v75_v22  ;;  %v80_v29 = vmul.f32 %v78_v25, %v78_v25  ;;  %v95_v33 = vadd.f32 %v94_v30, %v93_v27  ;;  %v92_v43 = vsub.f32 %v90_v36, %v91_v37 }
   0xf   :  { %v71_v28 = vadd.f32 %v70_v24, %v69_v23  ;;  %v46_v53 = vsub.f32 %v44_v47, %v45_v48  ;;  %v50_v54 = vsub.f32 %v48_v49, %v49_v50  ;;  %v53_v56 = vmul.f32 %v41_v14, %v40_v10 }
  0x10   :  { %v81_v32 = vadd.f32 %v80_v29, %v79_v26  ;;  %v54_v60 = vmul.f32 %v43_v16, %v42_v15  ;;  %v233_v18 = vmov 0.0  }
  0x11   :  { %v72_v31 = vadd.f32 1e-07, %v71_v28  ;;  %v47_v58 = vmax.f32 %v46_v53, 0.0  ;;  %v51_v59 = vmax.f32 %v50_v54, 0.0 }
  0x12   :  { %v82_v39 = vmul.f32 0.25, %v81_v32  ;;  %v55_v63 = vadd.f32 %v54_v60, %v53_v56 }
  0x13   :  { %168 = vrcp.f32 %v72_v31  ;;  %v52_v62 = vmul.f32 %v51_v59, %v47_v58 }
  0x14   :  { %170 = vrcp.f32 %v95_v33 }
  0x15   :  { %v56_v2 = vsub.f32 %v55_v63, %v52_v62 }
  0x17   :  { %v57_v7 = vadd.f32 1e-07, %v56_v2 }
  0x19   :  { %v169_v34 = vpop.eup %168 }
  0x1a   :  { %v85_v35 = vmul.f32 %v169_v34, %v72_v31  ;;  %v171_v38 = vpop.eup %170 }
  0x1b   :  { %v97_v41 = vmul.f32 %v171_v38, %v95_v33 }
  0x1c   :  { %v86_v40 = vsub.f32 2.0, %v85_v35 }
  0x1d   :  { %v98_v44 = vsub.f32 2.0, %v97_v41 }
  0x1e   :  { %v87_v42 = vmul.f32 %v169_v34, %v86_v40 }
  0x1f   :  { %v99_v46 = vmul.f32 %v171_v38, %v98_v44 }
  0x20   :  { %v248_v45 = vmul.f32 %v87_v42, %v82_v39 }
  0x21   :  { %v100_v51 = vmul.f32 %v99_v46, %v92_v43 }
  0x23   :  { %v101_v52 = vand.u32 2147483647, %v100_v51  ;;  %vm128_vm2 = vcmp.lt.f32.partialorder %v100_v51, 0.0 }
  0x25   :  { %vm102_vm0 = vcmp.gt.f32.partialorder %v101_v52, 2.4142137  ;;  %vm103_vm1 = vcmp.gt.f32.partialorder %v101_v52, 0.41421357  ;;  %v109_v55 = vadd.f32 1.0, %v101_v52  ;;  %v160_v0 = vadd.f32 -1.0, %v101_v52 }
  0x26   :  { %v104_v19 = vsel %vm103_vm1, 0.7853982, %v233_v18 }
  0x27   :  { %v110_v57 = vsel %vm103_vm1, %v109_v55, 1.0  ;;  %v107_v3 = vsel %vm103_vm1, %v160_v0, %v101_v52  ;;  %v105_v23 = vsel %vm102_vm0, 1.5707964, %v104_v19 }
  0x28   :  { %v111_v61 = vsel %vm102_vm0, %v101_v52, %v110_v57  ;;  %v108_v6 = vsel %vm102_vm0, -1.0, %v107_v3 }
  0x29   :  { %172 = vrcp.f32 %v111_v61 }
  0x2a   :  { %174 = vrcp.f32 %v57_v7 }
  0x2f   :  { %v173_v1 = vpop.eup %172 }
  0x30   :  { %v113_v4 = vmul.f32 %v173_v1, %v111_v61  ;;  %v175_v13 = vpop.eup %174 }
  0x31   :  { %v59_v16 = vmul.f32 %v175_v13, %v57_v7 }
  0x32   :  { %v114_v5 = vsub.f32 2.0, %v113_v4 }
  0x33   :  { %v60_v21 = vsub.f32 2.0, %v59_v16 }
  0x34   :  { %v115_v8 = vmul.f32 %v173_v1, %v114_v5 }
  0x35   :  { %v61_v25 = vmul.f32 %v175_v13, %v60_v21 }
  0x36   :  { %v116_v9 = vmul.f32 %v115_v8, %v108_v6 }
  0x37   :  { %v62_v28 = vmul.f32 %v61_v25, %v52_v62 }
  0x38   :  { %v117_v10 = vmul.f32 %v116_v9, %v116_v9 }
  0x39   :  { %v83_v31 = vsub.f32 1.0, %v62_v28 }
  0x3a   :  { %v118_v11 = vmul.f32 0.080537446, %v117_v10 }
  0x3b   :  { %v89_v40 = vadd.f32 %v248_v45, %v83_v31 }
  0x3c   :  { %v161_v12 = vadd.f32 -0.13877685, %v118_v11 }
  0x3e   :  { %v120_v14 = vmul.f32 %v161_v12, %v117_v10 }
  0x40   :  { %v121_v15 = vadd.f32 0.19977711, %v120_v14 }
  0x42   :  { %v122_v17 = vmul.f32 %v121_v15, %v117_v10 }
  0x44   :  { %v162_v20 = vadd.f32 -0.3333295, %v122_v17 }
  0x46   :  { %v124_v22 = vmul.f32 %v162_v20, %v117_v10 }
  0x48   :  { %v125_v24 = vmul.f32 %v124_v22, %v116_v9 }
  0x4a   :  { %v126_v26 = vadd.f32 %v125_v24, %v105_v23 }
  0x4c   :  { %v127_v27 = vadd.f32 %v126_v26, %v116_v9 }
  0x4e   :  { %v129_v29 = vsub.f32 0.0, %v127_v27 }
  0x50   :  { %v130_v30 = vsel %vm128_vm2, %v129_v29, %v127_v27 }
  0x51   :  { %v131_v32 = vmul.f32 %v130_v30, %v130_v30 }
  0x53   :  { %v132_v33 = vmul.f32 0.40528473, %v131_v32 }
  0x55   :  { %v133_v34 = vadd.f32 %v132_v33, %v83_v31 }
  0x57   :  { %v134_v35 = vadd.f32 1e-07, %v133_v34 }
  0x59   :  { %176 = vrcp.f32 %v134_v35 }
  0x5f   :  { %v177_v36 = vpop.eup %176 }
  0x60   :  { %v136_v37 = vmul.f32 %v177_v36, %v134_v35 }
  0x62   :  { %v137_v38 = vsub.f32 2.0, %v136_v37 }
  0x64   :  { %v138_v39 = vmul.f32 %v177_v36, %v137_v38 }
  0x66   :  { %v139_v41 = vmul.f32 %v138_v39, %v132_v33 }
  0x68   :  { %v140_v42 = vmul.f32 %v139_v41, %v132_v33 }
  0x6a   :  { %v141_v43 = vadd.f32 %v140_v42, %v89_v40 }
  0x6c   :  { %142 = vst [vmem:[#allocation5] sm:$0x1] %v141_v43 }
  0x6d   :  { %153 = dma.vmem_to_hbm [thread:$0]  %s149_s13, 16, %s151_s16, [#allocation4]  }
  0x6e   :  { %228 = dma.done.wait [#allocation4], 16  }
  0x6f   :  { %229 = vsyncadd [#allocation4], 4294967280 }
  0x70   :  { %158 = vsyncpa [#allocation3], 1 }
  0x71   :  { %159 = vsyncpa [#allocation4], 1 }

</bundles_post_ra>
